<compile_context>
chip_gen: v5e
topology: v5e:2x2
jax: 0.10.0
libtpu: 0.0.40
codegen_flags: <defaults>
</compile_context>

<pallas_src>
import functools

import jax
import jax.numpy as jnp
from jax.experimental import pallas as pl
from jax.experimental.pallas import tpu as pltpu

LANE = 128
SUBLANE = 8

_VMEM = pl.BlockSpec(memory_space=pltpu.MemorySpace.VMEM)


# ----------------------------- Pallas kernel --------------------------------

def _gcn_fused_kernel(adj_ref, x_ref, w1_ref, b1_ref, w2_ref, b2_ref, o_ref,
                      *, h_pad, c_pad, num_classes):
    adj = adj_ref[...]                       # [Np, Np] bf16 (row-normalized)
    x = x_ref[...]                           # [Np, Fp] bf16

    # ---------- Layer 1: fused self+neigh projection, reassociated agg ------
    # proj1 = x @ [W1_self | W1_neigh]  -> one MXU pass, K = Fp, N = 2*Hp
    proj1 = jnp.dot(x, w1_ref[...], preferred_element_type=jnp.float32)
    self1 = proj1[:, :h_pad]
    neigh1 = proj1[:, h_pad:].astype(jnp.bfloat16)
    agg1 = jnp.dot(adj, neigh1, preferred_element_type=jnp.float32)     # [Np, Hp]
    h = jnp.maximum(self1 + agg1 + b1_ref[...], 0.0)                    # ReLU
    # TODO(synk): F.dropout(training=self.training) is identity in eval mode.
    h_bf = h.astype(jnp.bfloat16)

    # ---------- Layer 2 ------------------------------------------------------
    proj2 = jnp.dot(h_bf, w2_ref[...], preferred_element_type=jnp.float32)
    self2 = proj2[:, :c_pad]
    neigh2 = proj2[:, c_pad:].astype(jnp.bfloat16)
    agg2 = jnp.dot(adj, neigh2, preferred_element_type=jnp.float32)     # [Np, Cp]
    logits = self2 + agg2 + b2_ref[...]

    # ---------- log_softmax over real classes (mask lane padding) -----------
    cls = jax.lax.broadcasted_iota(jnp.int32, logits.shape, 1)
    logits = jnp.where(cls < num_classes, logits, -jnp.inf)
    m = jnp.max(logits, axis=1, keepdims=True)
    z = logits - m
    lse = jnp.log(jnp.sum(jnp.exp(z), axis=1, keepdims=True))
    o_ref[...] = (z - lse).astype(o_ref.dtype)


# ------------------------------ JAX wrappers ---------------------------------

def _round_up(n, m):
    return ((n + m - 1) // m) * m


def _pad2(a, shape):
    return jnp.pad(a, [(0, s - d) for s, d in zip(shape, a.shape)])


def build_mean_adjacency(edge_index, num_nodes):
    """Dense row-normalized adjacency (glue, plain JAX).

    edge_index: int32 [2, E], messages flow src -> dst (dst row aggregates src).
    No self loops (use_self_loops=False in SageLayer).
    """
    src, dst = edge_index[0], edge_index[1]
    adj = jnp.zeros((num_nodes, num_nodes), jnp.float32)
    adj = adj.at[dst, src].add(1.0)
    deg = jnp.sum(adj, axis=1, keepdims=True)
    deg = jnp.where(deg > 0, deg, 1.0)       # isolated nodes aggregate zeros
    return adj / deg


@jax.jit
def gcn_forward(x, adj_mean, params):
    n, f = x.shape
    h_dim = params["w1_self"].shape[1]
    c_dim = params["w2_self"].shape[1]

    # Lane-dense padding (all last dims multiples of 128; node dim too since it
    # is both the sublane dim of x and the lane dim of adj).
    n_pad = _round_up(max(n, SUBLANE), LANE)
    f_pad = _round_up(f, LANE)
    h_pad = _round_up(h_dim, LANE)
    c_pad = _round_up(c_dim, LANE)

    adj_p = _pad2(adj_mean, (n_pad, n_pad)).astype(jnp.bfloat16)
    x_p = _pad2(x, (n_pad, f_pad)).astype(jnp.bfloat16)

    w1 = jnp.concatenate(
        [_pad2(params["w1_self"], (f_pad, h_pad)),
         _pad2(params["w1_neigh"], (f_pad, h_pad))], axis=1).astype(jnp.bfloat16)
    b1 = _pad2(params["b1"], (1, h_pad)).astype(jnp.float32)
    w2 = jnp.concatenate(
        [_pad2(params["w2_self"], (h_pad, c_pad)),
         _pad2(params["w2_neigh"], (h_pad, c_pad))], axis=1).astype(jnp.bfloat16)
    b2 = _pad2(params["b2"], (1, c_pad)).astype(jnp.float32)

    out_p = pl.pallas_call(
        functools.partial(_gcn_fused_kernel, h_pad=h_pad, c_pad=c_pad,
                          num_classes=c_dim),
        out_shape=jax.ShapeDtypeStruct((n_pad, c_pad), jnp.float32),
        in_specs=[_VMEM] * 6,
        out_specs=_VMEM,
        compiler_params=pltpu.CompilerParams(vmem_limit_bytes=32 * 1024 * 1024),
    )(adj_p, x_p, w1, b1, w2, b2)

    return out_p[:n, :c_dim]


# --------------------------------- main ---------------------------------------

if __name__ == "__main__":
    # Small synthetic "Cora-like" graph.
    NUM_NODES = 64
    NUM_FEATS = 32
    HIDDEN = 16
    NUM_CLASSES = 8
    NUM_EDGES = 256

    key = jax.random.PRNGKey(0)
    kx, ke1, ke2, kw1s, kw1n, kw2s, kw2n = jax.random.split(key, 7)

    x = jax.random.normal(kx, (NUM_NODES, NUM_FEATS), jnp.float32)
    src = jax.random.randint(ke1, (NUM_EDGES,), 0, NUM_NODES, jnp.int32)
    dst = jax.random.randint(ke2, (NUM_EDGES,), 0, NUM_NODES, jnp.int32)
    edge_index = jnp.stack([src, dst], axis=0)

    def glorot(k, shape):
        limit = jnp.sqrt(6.0 / (shape[0] + shape[1]))
        return jax.random.uniform(k, shape, jnp.float32, -limit, limit)

    params = {
        "w1_self": glorot(kw1s, (NUM_FEATS, HIDDEN)),
        "w1_neigh": glorot(kw1n, (NUM_FEATS, HIDDEN)),
        "b1": jnp.zeros((1, HIDDEN), jnp.float32),
        "w2_self": glorot(kw2s, (HIDDEN, NUM_CLASSES)),
        "w2_neigh": glorot(kw2n, (HIDDEN, NUM_CLASSES)),
        "b2": jnp.zeros((1, NUM_CLASSES), jnp.float32),
    }

    adj_mean = build_mean_adjacency(edge_index, NUM_NODES)

    out = gcn_forward(x, adj_mean, params)
    out = jax.block_until_ready(out)

    # sanity: log_softmax rows sum to 1 in probability space
    assert out.shape == (NUM_NODES, NUM_CLASSES)
    row_sums = jnp.sum(jnp.exp(out), axis=1)
    assert bool(jnp.all(jnp.abs(row_sums - 1.0) < 1e-3))
    assert bool(jnp.all(jnp.isfinite(out)))

    print("KERNEL_OK")
</pallas_src>

<mosaic_0001>
module attributes {stable_mosaic.version = 11 : i64} {
  func.func @_gcn_fused_kernel(%arg0: memref<128x128xbf16, #tpu.memory_space<vmem>>, %arg1: memref<128x128xbf16, #tpu.memory_space<vmem>>, %arg2: memref<128x256xbf16, #tpu.memory_space<vmem>>, %arg3: memref<1x128xf32, #tpu.memory_space<vmem>>, %arg4: memref<128x256xbf16, #tpu.memory_space<vmem>>, %arg5: memref<1x128xf32, #tpu.memory_space<vmem>>, %arg6: memref<128x128xf32, #tpu.memory_space<vmem>>) attributes {dimension_semantics = [], scalar_prefetch = 0 : i64, scratch_operands = 0 : i64, tpu.core_type = #tpu.core_type<tc>} {
    %c0 = arith.constant 0 : index
    %c0_0 = arith.constant 0 : index
    %0 = vector.load %arg0[%c0, %c0_0] : memref<128x128xbf16, #tpu.memory_space<vmem>>, vector<128x128xbf16>
    %c0_1 = arith.constant 0 : index
    %c0_2 = arith.constant 0 : index
    %1 = vector.load %arg1[%c0_1, %c0_2] : memref<128x128xbf16, #tpu.memory_space<vmem>>, vector<128x128xbf16>
    %c0_3 = arith.constant 0 : index
    %c0_4 = arith.constant 0 : index
    %2 = vector.load %arg2[%c0_3, %c0_4] : memref<128x256xbf16, #tpu.memory_space<vmem>>, vector<128x256xbf16>
    %cst = arith.constant dense<0.000000e+00> : vector<128x256xf32>
    %3 = tpu.matmul %1, %2, %cst {dimension_numbers = #tpu.dot_dimension_numbers<[1], [0], [0], [1], [0, 0, 1, 1], [], []>} : vector<128x128xbf16>, vector<128x256xbf16>, vector<128x256xf32> -> vector<128x256xf32>
    %4 = vector.extract_strided_slice %3 {offsets = [0, 0], sizes = [128, 128], strides = [1, 1]} : vector<128x256xf32> to vector<128x128xf32>
    %5 = vector.extract_strided_slice %3 {offsets = [0, 128], sizes = [128, 128], strides = [1, 1]} : vector<128x256xf32> to vector<128x128xf32>
    %6 = arith.truncf %5 : vector<128x128xf32> to vector<128x128xbf16>
    %cst_5 = arith.constant dense<0.000000e+00> : vector<128x128xf32>
    %7 = tpu.matmul %0, %6, %cst_5 {dimension_numbers = #tpu.dot_dimension_numbers<[1], [0], [0], [1], [0, 0, 1, 1], [], []>} : vector<128x128xbf16>, vector<128x128xbf16>, vector<128x128xf32> -> vector<128x128xf32>
    %8 = arith.addf %4, %7 : vector<128x128xf32>
    %c0_6 = arith.constant 0 : index
    %c0_7 = arith.constant 0 : index
    %9 = vector.load %arg3[%c0_6, %c0_7] : memref<1x128xf32, #tpu.memory_space<vmem>>, vector<1x128xf32>
    %10 = vector.broadcast %9 : vector<1x128xf32> to vector<128x128xf32>
    %11 = arith.addf %8, %10 : vector<128x128xf32>
    %cst_8 = arith.constant 0.000000e+00 : f32
    %12 = vector.broadcast %cst_8 : f32 to vector<128x128xf32>
    %13 = arith.maximumf %11, %12 : vector<128x128xf32>
    %14 = arith.truncf %13 : vector<128x128xf32> to vector<128x128xbf16>
    %c0_9 = arith.constant 0 : index
    %c0_10 = arith.constant 0 : index
    %15 = vector.load %arg4[%c0_9, %c0_10] : memref<128x256xbf16, #tpu.memory_space<vmem>>, vector<128x256xbf16>
    %cst_11 = arith.constant dense<0.000000e+00> : vector<128x256xf32>
    %16 = tpu.matmul %14, %15, %cst_11 {dimension_numbers = #tpu.dot_dimension_numbers<[1], [0], [0], [1], [0, 0, 1, 1], [], []>} : vector<128x128xbf16>, vector<128x256xbf16>, vector<128x256xf32> -> vector<128x256xf32>
    %17 = vector.extract_strided_slice %16 {offsets = [0, 0], sizes = [128, 128], strides = [1, 1]} : vector<128x256xf32> to vector<128x128xf32>
    %18 = vector.extract_strided_slice %16 {offsets = [0, 128], sizes = [128, 128], strides = [1, 1]} : vector<128x256xf32> to vector<128x128xf32>
    %19 = arith.truncf %18 : vector<128x128xf32> to vector<128x128xbf16>
    %cst_12 = arith.constant dense<0.000000e+00> : vector<128x128xf32>
    %20 = tpu.matmul %0, %19, %cst_12 {dimension_numbers = #tpu.dot_dimension_numbers<[1], [0], [0], [1], [0, 0, 1, 1], [], []>} : vector<128x128xbf16>, vector<128x128xbf16>, vector<128x128xf32> -> vector<128x128xf32>
    %21 = arith.addf %17, %20 : vector<128x128xf32>
    %c0_13 = arith.constant 0 : index
    %c0_14 = arith.constant 0 : index
    %22 = vector.load %arg5[%c0_13, %c0_14] : memref<1x128xf32, #tpu.memory_space<vmem>>, vector<1x128xf32>
    %23 = vector.broadcast %22 : vector<1x128xf32> to vector<128x128xf32>
    %24 = arith.addf %21, %23 : vector<128x128xf32>
    %25 = tpu.iota {dimensions = array<i32: 1>} : vector<128x128xi32>
    %c8_i32 = arith.constant 8 : i32
    %26 = vector.broadcast %c8_i32 : i32 to vector<128x128xi32>
    %27 = arith.cmpi slt, %25, %26 : vector<128x128xi32>
    %cst_15 = arith.constant 0xFF800000 : f32
    %28 = vector.broadcast %cst_15 : f32 to vector<128x128xf32>
    %29 = arith.select %27, %24, %28 : vector<128x128xi1>, vector<128x128xf32>
    %cst_16 = arith.constant dense<0xFF800000> : vector<128xf32>
    %30 = vector.multi_reduction <maximumf>, %29, %cst_16 [1] : vector<128x128xf32> to vector<128xf32>
    %31 = vector.shape_cast %30 : vector<128xf32> to vector<128x1xf32>
    %32 = vector.broadcast %31 : vector<128x1xf32> to vector<128x128xf32>
    %33 = arith.subf %29, %32 : vector<128x128xf32>
    %34 = math.exp %33 : vector<128x128xf32>
    %cst_17 = arith.constant dense<0.000000e+00> : vector<128xf32>
    %35 = vector.multi_reduction <add>, %34, %cst_17 [1] : vector<128x128xf32> to vector<128xf32>
    %36 = vector.shape_cast %35 : vector<128xf32> to vector<128x1xf32>
    %37 = math.log %36 : vector<128x1xf32>
    %38 = vector.broadcast %37 : vector<128x1xf32> to vector<128x128xf32>
    %39 = arith.subf %33, %38 : vector<128x128xf32>
    %c0_18 = arith.constant 0 : index
    %c0_19 = arith.constant 0 : index
    %40 = vector.load %arg6[%c0_18, %c0_19] : memref<128x128xf32, #tpu.memory_space<vmem>>, vector<128x128xf32>
    tpu.vector_store %arg6[%c0_18, %c0_19], %39 {strides = array<i32>} : memref<128x128xf32, #tpu.memory_space<vmem>>, vector<128x128xf32>,
    return
  }
}

</mosaic_0001>

<bundles_post_ra>
// kernel: gcn_forward.1
= control target key start
LH: loop header
LB: loop body
LE: loop exit
PB: predicated region body
PF: predicated region fallthrough
CT: control target
= control target key end

     0   :  { %s1854_s2 = inlined_call_operand.vmem [shape: bf16[128,256], index: 2, kind: input, shape index: {}]   ;;  %s1855_s1 = inlined_call_operand.vmem [shape: bf16[128,128], index: 1, kind: input, shape index: {}]   ;;  %s1856_s3 = inlined_call_operand.vmem [shape: f32[1,128], index: 3, kind: input, shape index: {}]   ;;  %s1857_s0 = inlined_call_operand.vmem [shape: bf16[128,128], index: 0, kind: input, shape index: {}]   ;;  %s1858_s4 = inlined_call_operand.vmem [shape: bf16[128,256], index: 4, kind: input, shape index: {}]   ;;  %s1859_s5 = inlined_call_operand.vmem [shape: f32[1,128], index: 5, kind: input, shape index: {}]   ;;  %s1860_s6 = inlined_call_operand.vmem [shape: f32[128,128], index: 6, kind: output, shape index: {}]  }
   0x1   :  { %v1170_v0 = vld [vmem:[%s1854_s2 + $0x74] sm:$0xf]  ;;  %v1040_v1 = vld [vmem:[%s1854_s2 + $0x78] sm:$0xf0]  ;;  %v1168_v2 = vld [vmem:[%s1854_s2 + $0x64] sm:$0xf] }
   0x2   :  { %v1043_v3 = vor.u32 %v1170_v0, %v1040_v1  ;;  %v1032_v4 = vld [vmem:[%s1854_s2 + $0x68] sm:$0xf0]  ;;  %v1166_v6 = vld [vmem:[%s1854_s2 + $0x54] sm:$0xf]  ;;  %v1024_v7 = vld [vmem:[%s1854_s2 + $0x58] sm:$0xf0] }
   0x3   :  { %v1035_v5 = vor.u32 %v1168_v2, %v1032_v4  ;;  %v1027_v8 = vor.u32 %v1166_v6, %v1024_v7  ;;  %v1164_v9 = vld [vmem:[%s1854_s2 + $0x44] sm:$0xf]  ;;  %v1016_v10 = vld [vmem:[%s1854_s2 + $0x48] sm:$0xf0]  ;;  %v1162_v12 = vld [vmem:[%s1854_s2 + $0x34] sm:$0xf] }
   0x4   :  { %1196 = vmatpush.bf16.msra.mxu3 %v1043_v3  ;;  %248 = vmatpush.bf16.msra.mxu1 %v1043_v3  ;;  %v1019_v11 = vor.u32 %v1164_v9, %v1016_v10  ;;  %v1008_v13 = vld [vmem:[%s1854_s2 + $0x38] sm:$0xf0]  ;;  %v1160_v15 = vld [vmem:[%s1854_s2 + $0x24] sm:$0xf]  ;;  %v1000_v16 = vld [vmem:[%s1854_s2 + $0x28] sm:$0xf0] }
   0x5   :  { %v1011_v14 = vor.u32 %v1162_v12, %v1008_v13  ;;  %v1003_v17 = vor.u32 %v1160_v15, %v1000_v16  ;;  %v1158_v18 = vld [vmem:[%s1854_s2 + $0x14] sm:$0xf]  ;;  %v992_v19 = vld [vmem:[%s1854_s2 + $0x18] sm:$0xf0]  ;;  %v1156_v21 = vld [vmem:[%s1854_s2 + $0x4] sm:$0xf] }
   0x6   :  { %v995_v20 = vor.u32 %v1158_v18, %v992_v19  ;;  %v984_v22 = vld [vmem:[%s1854_s2 + $0x8] sm:$0xf0]  ;;  %v1152_v24 = vld [vmem:[%s1855_s1 + $0x20] sm:$0xff]  ;;  %v1038_v28 = vld [vmem:[%s1854_s2 + $0x70] sm:$0xf] }
   0x7   :  { %v987_v23 = vor.u32 %v1156_v21, %v984_v22  ;;  %v1148_v25 = vld [vmem:[%s1855_s1] sm:$0xff]  ;;  %v1153_v26 = vld [vmem:[%s1855_s1 + $0x28] sm:$0xff]  ;;  %v1171_v29 = vld [vmem:[%s1854_s2 + $0x74] sm:$0xf0] }
   0x8   :  { %1197 = vmatpush.bf16.msra.mxu3 %v1035_v5  ;;  %249 = vmatpush.bf16.msra.mxu1 %v1035_v5  ;;  %v1149_v27 = vld [vmem:[%s1855_s1 + $0x8] sm:$0xff]  ;;  %v1039_v30 = vor.u32 %v1171_v29, %v1038_v28  ;;  %v1030_v31 = vld [vmem:[%s1854_s2 + $0x60] sm:$0xf]  ;;  %v1022_v34 = vld [vmem:[%s1854_s2 + $0x50] sm:$0xf] }
   0x9   :  { %v1169_v32 = vld [vmem:[%s1854_s2 + $0x64] sm:$0xf0]  ;;  %v1167_v35 = vld [vmem:[%s1854_s2 + $0x54] sm:$0xf0]  ;;  %v1014_v37 = vld [vmem:[%s1854_s2 + $0x40] sm:$0xf] }
   0xa   :  { %1188 = vmatpush.bf16.msra.mxu2 %v1039_v30  ;;  %v1031_v33 = vor.u32 %v1169_v32, %v1030_v31  ;;  %199 = vmatpush.bf16.msra.mxu0 %v1039_v30  ;;  %v1023_v36 = vor.u32 %v1167_v35, %v1022_v34  ;;  %v1165_v38 = vld [vmem:[%s1854_s2 + $0x44] sm:$0xf0]  ;;  %v1154_v40 = vld [vmem:[%s1855_s1 + $0x30] sm:$0xff]  ;;  %v1155_v42 = vld [vmem:[%s1855_s1 + $0x38] sm:$0xff] }
   0xb   :  { %v1015_v39 = vor.u32 %v1165_v38, %v1014_v37  ;;  %v1150_v41 = vld [vmem:[%s1855_s1 + $0x10] sm:$0xff]  ;;  %v1151_v43 = vld [vmem:[%s1855_s1 + $0x18] sm:$0xff]  ;;  %v998_v46 = vld [vmem:[%s1854_s2 + $0x20] sm:$0xf] }
   0xc   :  { %1198 = vmatpush.bf16.msra.mxu3 %v1027_v8  ;;  %250 = vmatpush.bf16.msra.mxu1 %v1027_v8  ;;  %v1006_v44 = vld [vmem:[%s1854_s2 + $0x30] sm:$0xf]  ;;  %v1163_v45 = vld [vmem:[%s1854_s2 + $0x34] sm:$0xf0]  ;;  %v1161_v48 = vld [vmem:[%s1854_s2 + $0x24] sm:$0xf0] }
   0xd   :  { %v1007_v47 = vor.u32 %v1163_v45, %v1006_v44  ;;  %v999_v49 = vor.u32 %v1161_v48, %v998_v46  ;;  %v990_v50 = vld [vmem:[%s1854_s2 + $0x10] sm:$0xf]  ;;  %v1159_v51 = vld [vmem:[%s1854_s2 + $0x14] sm:$0xf0]  ;;  %v982_v53 = vld [vmem:[%s1854_s2] sm:$0xf] }
   0xe   :  { %1189 = vmatpush.bf16.msra.mxu2 %v1031_v33  ;;  %200 = vmatpush.bf16.msra.mxu0 %v1031_v33  ;;  %v991_v52 = vor.u32 %v1159_v51, %v990_v50  ;;  %v1157_v54 = vld [vmem:[%s1854_s2 + $0x4] sm:$0xf0]  ;;  %v1428_v16 = vld [vmem:[%s1857_s0] sm:$0xff]  ;;  %v1440_v18 = vld [vmem:[%s1857_s0 + $0x10] sm:$0xff] }
   0xf   :  { %v983_v55 = vor.u32 %v1157_v54, %v982_v53  ;;  %v1446_v19 = vld [vmem:[%s1857_s0 + $0x18] sm:$0xff]  ;;  %v1454_v21 = vld [vmem:[%s1857_s0 + $0x20] sm:$0xff]  ;;  %v1185_v31 = vld [vmem:[%s1858_s4 + $0x64] sm:$0xf0] }
  0x10   :  { %1199 = vmatpush.bf16.msra.mxu3 %v1019_v11  ;;  %251 = vmatpush.bf16.msra.mxu1 %v1019_v11  ;;  %v1136_v29 = vld [vmem:[%s1858_s4 + $0x78] sm:$0xf0]  ;;  %v1126_v30 = vld [vmem:[%s1858_s4 + $0x60] sm:$0xf]  ;;  %v1184_v33 = vld [vmem:[%s1858_s4 + $0x64] sm:$0xf] }
  0x11   :  { %v1128_v34 = vld [vmem:[%s1858_s4 + $0x68] sm:$0xf0]  ;;  %v1118_v38 = vld [vmem:[%s1858_s4 + $0x50] sm:$0xf]  ;;  %v1110_v44 = vld [vmem:[%s1858_s4 + $0x40] sm:$0xf] }
  0x12   :  { %1190 = vmatpush.bf16.msra.mxu2 %v1023_v36  ;;  %201 = vmatpush.bf16.msra.mxu0 %v1023_v36  ;;  %v1127_v36 = vor.u32 %v1185_v31, %v1126_v30  ;;  %v1131_v37 = vor.u32 %v1184_v33, %v1128_v34  ;;  %v1181_v45 = vld [vmem:[%s1858_s4 + $0x44] sm:$0xf0]  ;;  %v1180_v46 = vld [vmem:[%s1858_s4 + $0x44] sm:$0xf]  ;;  %v1179_v53 = vld [vmem:[%s1858_s4 + $0x34] sm:$0xf0] }
  0x13   :  { %v1111_v48 = vor.u32 %v1181_v45, %v1110_v44  ;;  %v1178_v54 = vld [vmem:[%s1858_s4 + $0x34] sm:$0xf] }
  0x14   :  { %1200 = vmatpush.bf16.msra.mxu3 %v1011_v14  ;;  %252 = vmatpush.bf16.msra.mxu1 %v1011_v14 }
  0x16   :  { %1191 = vmatpush.bf16.msra.mxu2 %v1015_v39  ;;  %202 = vmatpush.bf16.msra.mxu0 %v1015_v39  ;;  %v1183_v39 = vld [vmem:[%s1858_s4 + $0x54] sm:$0xf0] }
  0x18   :  { %1201 = vmatpush.bf16.msra.mxu3 %v1003_v17  ;;  %253 = vmatpush.bf16.msra.mxu1 %v1003_v17  ;;  %v1434_v17 = vld [vmem:[%s1857_s0 + $0x8] sm:$0xff] }
  0x1a   :  { %1192 = vmatpush.bf16.msra.mxu2 %v1007_v47  ;;  %203 = vmatpush.bf16.msra.mxu0 %v1007_v47  ;;  %v1112_v47 = vld [vmem:[%s1858_s4 + $0x48] sm:$0xf0] }
  0x1b   :  { %v1115_v50 = vor.u32 %v1180_v46, %v1112_v47 }
  0x1c   :  { %1202 = vmatpush.bf16.msra.mxu3 %v995_v20  ;;  %254 = vmatpush.bf16.msra.mxu1 %v995_v20 }
  0x1e   :  { %1193 = vmatpush.bf16.msra.mxu2 %v999_v49  ;;  %204 = vmatpush.bf16.msra.mxu0 %v999_v49  ;;  %v1520_v49 = vld [vmem:[%s1857_s0 + $0x30] sm:$0xff] }
  0x20   :  { %1203 = vmatpush.bf16.msra.mxu3 %v987_v23  ;;  %255 = vmatpush.bf16.msra.mxu1 %v987_v23 }
  0x22   :  { %1194 = vmatpush.bf16.msra.mxu2 %v991_v52  ;;  %205 = vmatpush.bf16.msra.mxu0 %v991_v52  ;;  %v1102_v52 = vld [vmem:[%s1858_s4 + $0x30] sm:$0xf] }
  0x23   :  { %276 = vmatmul.bf16.vlgmr.msra.gmra.mxu3 %v1152_v24  ;;  %256 = vmatmul.bf16.vlgmr.msra.gmra.mxu1 %v1148_v25 }
  0x26   :  { %1195 = vmatpush.bf16.msra.mxu2 %v983_v55  ;;  %206 = vmatpush.bf16.msra.mxu0 %v983_v55  ;;  %v1103_v55 = vor.u32 %v1179_v53, %v1102_v52 }
  0x29   :  { %227 = vmatmul.bf16.vlgmr.msra.gmra.mxu2 %v1152_v24  ;;  %207 = vmatmul.bf16.vlgmr.msra.gmra.mxu0 %v1148_v25  ;;  %v1464_v24 = vld [vmem:[%s1857_s0 + $0x28] sm:$0xff]  ;;  %v1134_v25 = vld [vmem:[%s1858_s4 + $0x70] sm:$0xf] }
  0x33   :  { %281 = vmatmul.bf16.gmra.mxu3 %v1153_v26  ;;  %261 = vmatmul.bf16.gmra.mxu1 %v1149_v27 }
  0x39   :  { %232 = vmatmul.bf16.gmra.mxu2 %v1153_v26  ;;  %212 = vmatmul.bf16.gmra.mxu0 %v1149_v27  ;;  %v1187_v26 = vld [vmem:[%s1858_s4 + $0x74] sm:$0xf0]  ;;  %v1186_v27 = vld [vmem:[%s1858_s4 + $0x74] sm:$0xf] }
  0x3a   :  { %v1135_v28 = vor.u32 %v1187_v26, %v1134_v25  ;;  %v1139_v32 = vor.u32 %v1186_v27, %v1136_v29  ;;  %v1588_v29 = vld [vmem:[%s1856_s3] ss:$0 sm:$0xff] }
  0x3c   :  { %558 = vmatpush.bf16.msrb.mxu3 %v1135_v28  ;;  %607 = vmatpush.bf16.msrb.mxu0 %v1139_v32 }
  0x40   :  { %559 = vmatpush.bf16.msrb.mxu3 %v1127_v36  ;;  %608 = vmatpush.bf16.msrb.mxu0 %v1131_v37 }
  0x43   :  { %286 = vmatmul.bf16.gmra.mxu3 %v1154_v40  ;;  %266 = vmatmul.bf16.gmra.mxu1 %v1150_v41 }
  0x49   :  { %237 = vmatmul.bf16.gmra.mxu2 %v1154_v40  ;;  %217 = vmatmul.bf16.gmra.mxu0 %v1150_v41  ;;  %v1182_v40 = vld [vmem:[%s1858_s4 + $0x54] sm:$0xf]  ;;  %v1120_v41 = vld [vmem:[%s1858_s4 + $0x58] sm:$0xf0] }
  0x53   :  { %291 = vmatmul.bf16.gmra.mxu3 %v1155_v42  ;;  %271 = vmatmul.bf16.gmra.mxu1 %v1151_v43 }
  0x59   :  { %242 = vmatmul.bf16.gmra.mxu2 %v1155_v42  ;;  %222 = vmatmul.bf16.gmra.mxu0 %v1151_v43  ;;  %v1119_v42 = vor.u32 %v1183_v39, %v1118_v38  ;;  %v1123_v43 = vor.u32 %v1182_v40, %v1120_v41 }
  0x5b   :  { %560 = vmatpush.bf16.msrb.mxu3 %v1119_v42  ;;  %609 = vmatpush.bf16.msrb.mxu0 %v1123_v43 }
  0x5f   :  { %561 = vmatpush.bf16.msrb.mxu3 %v1111_v48  ;;  %610 = vmatpush.bf16.msrb.mxu0 %v1115_v50 }
  0x63   :  { %562 = vmatpush.bf16.msrb.mxu3 %v1103_v55 }
  0xa0   :  { %v257_v57 = vpop.f32.mrf.mxu1 }
  0xa6   :  { %v277_v56 = vpop.f32.mrf.mxu3 }
  0xa8   :  { %v259_v59 = vpop.f32.mrf.mxu1 }
  0xa9   :  { %v297_v15 = vpack.c.bf16 %v259_v59, %v257_v57  ;;  %v1177_v59 = vld [vmem:[%s1858_s4 + $0x24] sm:$0xf0] }
  0xac   :  { %v1449_v20 = vpop.f32.mrf.mxu2 }
  0xae   :  { %v279_v58 = vpop.f32.mrf.mxu3 }
  0xaf   :  { %v301_v10 = vpack.c.bf16 %v279_v58, %v277_v56  ;;  %v1104_v56 = vld [vmem:[%s1858_s4 + $0x38] sm:$0xf0]  ;;  %v1094_v58 = vld [vmem:[%s1858_s4 + $0x20] sm:$0xf] }
  0xb0   :  { %v262_v61 = vpop.f32.mrf.mxu1  ;;  %v1107_v57 = vor.u32 %v1178_v54, %v1104_v56 }
  0xb2   :  { %611 = vmatpush.bf16.msrb.mxu0 %v1107_v57 }
  0xb4   :  { %v1456_v22 = vpop.f32.mrf.mxu2 }
  0xb6   :  { %v282_v60 = vpop.f32.mrf.mxu3 }
  0xb8   :  { %v264_v63 = vpop.f32.mrf.mxu1 }
  0xb9   :  { %v298_v14 = vpack.c.bf16 %v264_v63, %v262_v61  ;;  %v1096_v63 = vld [vmem:[%s1858_s4 + $0x28] sm:$0xf0] }
  0xbc   :  { %v1459_v23 = vpop.f32.mrf.mxu2 }
  0xbe   :  { %v284_v62 = vpop.f32.mrf.mxu3 }
  0xbf   :  { %v302_v9 = vpack.c.bf16 %v284_v62, %v282_v60  ;;  %v1176_v60 = vld [vmem:[%s1858_s4 + $0x24] sm:$0xf]  ;;  %v1095_v62 = vor.u32 %v1177_v59, %v1094_v58 }
  0xc0   :  { %v267_v1 = vpop.f32.mrf.mxu1 }
  0xc1   :  { %563 = vmatpush.bf16.msrb.mxu3 %v1095_v62 }
  0xc4   :  { %v1491_v35 = vpop.f32.mrf.mxu2 }
  0xc6   :  { %v287_v0 = vpop.f32.mrf.mxu3 }
  0xc8   :  { %v269_v4 = vpop.f32.mrf.mxu1 }
  0xc9   :  { %v299_v13 = vpack.c.bf16 %v269_v4, %v267_v1  ;;  %v1086_v1 = vld [vmem:[%s1858_s4 + $0x10] sm:$0xf] }
  0xcc   :  { %v1522_v51 = vpop.f32.mrf.mxu2 }
  0xce   :  { %v289_v2 = vpop.f32.mrf.mxu3 }
  0xcf   :  { %v303_v8 = vpack.c.bf16 %v289_v2, %v287_v0  ;;  %v1099_v0 = vor.u32 %v1176_v60, %v1096_v63  ;;  %v1175_v2 = vld [vmem:[%s1858_s4 + $0x14] sm:$0xf0] }
  0xd0   :  { %v272_v7 = vpop.f32.mrf.mxu1  ;;  %v1087_v4 = vor.u32 %v1175_v2, %v1086_v1 }
  0xd1   :  { %612 = vmatpush.bf16.msrb.mxu0 %v1099_v0 }
  0xd2   :  { %564 = vmatpush.bf16.msrb.mxu3 %v1087_v4 }
  0xd4   :  { %v1546_v61 = vpop.f32.mrf.mxu2 }
  0xd6   :  { %v292_v3 = vpop.f32.mrf.mxu3 }
  0xd8   :  { %v274_v11 = vpop.f32.mrf.mxu1 }
  0xd9   :  { %v300_v12 = vpack.c.bf16 %v274_v11, %v272_v7 }
  0xde   :  { %v294_v5 = vpop.f32.mrf.mxu3 }
  0xdf   :  { %v304_v6 = vpack.c.bf16 %v294_v5, %v292_v3  ;;  %v1174_v3 = vld [vmem:[%s1858_s4 + $0x14] sm:$0xf]  ;;  %v1088_v5 = vld [vmem:[%s1858_s4 + $0x18] sm:$0xf0] }
  0xe0   :  { %v1091_v7 = vor.u32 %v1174_v3, %v1088_v5 }
  0xe1   :  { %353 = vmatpush.bf16.msrb.mxu2 %v304_v6  ;;  %v1566_v6 = vld [vmem:[%s1857_s0 + $0x38] sm:$0xff] }
  0xe2   :  { %613 = vmatpush.bf16.msrb.mxu0 %v1091_v7 }
  0xe5   :  { %354 = vmatpush.bf16.msrb.mxu2 %v303_v8  ;;  %v1078_v8 = vld [vmem:[%s1858_s4] sm:$0xf] }
  0xe9   :  { %355 = vmatpush.bf16.msrb.mxu2 %v302_v9  ;;  %v1173_v9 = vld [vmem:[%s1858_s4 + $0x4] sm:$0xf0] }
  0xea   :  { %v1079_v11 = vor.u32 %v1173_v9, %v1078_v8 }
  0xec   :  { %565 = vmatpush.bf16.msrb.mxu3 %v1079_v11 }
  0xed   :  { %356 = vmatpush.bf16.msrb.mxu2 %v301_v10  ;;  %v1172_v10 = vld [vmem:[%s1858_s4 + $0x4] sm:$0xf] }
  0xf1   :  { %357 = vmatpush.bf16.msrb.mxu2 %v300_v12  ;;  %v1080_v12 = vld [vmem:[%s1858_s4 + $0x8] sm:$0xf0] }
  0xf5   :  { %358 = vmatpush.bf16.msrb.mxu2 %v299_v13  ;;  %v1083_v13 = vor.u32 %v1172_v10, %v1080_v12 }
  0xf7   :  { %614 = vmatpush.bf16.msrb.mxu0 %v1083_v13 }
  0xf9   :  { %359 = vmatpush.bf16.msrb.mxu2 %v298_v14  ;;  %v1581_v14 = vpop.f32.mrf.mxu2 }
  0xfd   :  { %360 = vmatpush.bf16.msrb.mxu2 %v297_v15  ;;  %v208_v15 = vpop.f32.mrf.mxu0 }
 0x100   :  { %361 = vmatmul.bf16.vlgmr.msrb.gmra.mxu2 %v1428_v16 }
 0x101   :  { %v1583_v25 = vpop.f32.mrf.mxu2 }
 0x105   :  { %v210_v26 = vpop.f32.mrf.mxu0 }
 0x10d   :  { %v213_v30 = vpop.f32.mrf.mxu0 }
 0x110   :  { %366 = vmatmul.bf16.gmra.mxu2 %v1434_v17 }
 0x115   :  { %v215_v39 = vpop.f32.mrf.mxu0 }
 0x11d   :  { %v218_v45 = vpop.f32.mrf.mxu0 }
 0x120   :  { %371 = vmatmul.bf16.gmra.mxu2 %v1440_v18 }
 0x125   :  { %v220_v53 = vpop.f32.mrf.mxu0 }
 0x12d   :  { %v223_v62 = vpop.f32.mrf.mxu0 }
 0x130   :  { %376 = vmatmul.bf16.gmra.mxu2 %v1446_v19 }
 0x135   :  { %v225_v2 = vpop.f32.mrf.mxu0 }
 0x140   :  { %381 = vmatmul.bf16.gmra.mxu2 %v1454_v21 }
 0x150   :  { %386 = vmatmul.bf16.gmra.mxu2 %v1464_v24 }
 0x160   :  { %391 = vmatmul.bf16.gmra.mxu2 %v1520_v49 }
 0x170   :  { %396 = vmatmul.bf16.gmra.mxu2 %v1566_v6 }
 0x183   :  { %v362_v27 = vpop.f32.mrf.mxu2 }
 0x184   :  { %v402_v28 = vadd.f32 %v362_v27, %v208_v15 }
 0x186   :  { %v422_v32 = vadd.f32 %v1588_v29, %v402_v28 }
 0x188   :  { %v438_v36 = vmax.f32 %v422_v32, 0.0 }
 0x18b   :  { %v364_v31 = vpop.f32.mrf.mxu2 }
 0x18c   :  { %v403_v33 = vadd.f32 %v364_v31, %v210_v26 }
 0x18e   :  { %v423_v34 = vadd.f32 %v1588_v29, %v403_v33 }
 0x190   :  { %v439_v37 = vmax.f32 %v423_v34, 0.0 }
 0x192   :  { %v454_v38 = vpack.c.bf16 %v439_v37, %v438_v36 }
 0x193   :  { %v367_v40 = vpop.f32.mrf.mxu2 }
 0x194   :  { %566 = vmatmul.bf16.vlgmr.msrb.gmra.mxu3 %v454_v38  ;;  %615 = vmatmul.bf16.vlgmr.msrb.gmra.mxu0 %v454_v38  ;;  %v404_v41 = vadd.f32 %v367_v40, %v213_v30 }
 0x196   :  { %v424_v43 = vadd.f32 %v1588_v29, %v404_v41 }
 0x198   :  { %v440_v47 = vmax.f32 %v424_v43, 0.0 }
 0x19b   :  { %v369_v42 = vpop.f32.mrf.mxu2 }
 0x19c   :  { %v405_v44 = vadd.f32 %v369_v42, %v215_v39 }
 0x19e   :  { %v425_v46 = vadd.f32 %v1588_v29, %v405_v44 }
 0x1a0   :  { %v441_v48 = vmax.f32 %v425_v46, 0.0 }
 0x1a2   :  { %v455_v50 = vpack.c.bf16 %v441_v48, %v440_v47 }
 0x1a3   :  { %v372_v52 = vpop.f32.mrf.mxu2 }
 0x1a4   :  { %571 = vmatmul.bf16.gmra.mxu3 %v455_v50  ;;  %620 = vmatmul.bf16.gmra.mxu0 %v455_v50  ;;  %v406_v54 = vadd.f32 %v372_v52, %v218_v45 }
 0x1a6   :  { %v426_v56 = vadd.f32 %v1588_v29, %v406_v54 }
 0x1a8   :  { %v442_v59 = vmax.f32 %v426_v56, 0.0 }
 0x1ab   :  { %v374_v55 = vpop.f32.mrf.mxu2 }
 0x1ac   :  { %v407_v57 = vadd.f32 %v374_v55, %v220_v53 }
 0x1ae   :  { %v427_v58 = vadd.f32 %v1588_v29, %v407_v57 }
 0x1b0   :  { %v443_v60 = vmax.f32 %v427_v58, 0.0 }
 0x1b2   :  { %v456_v63 = vpack.c.bf16 %v443_v60, %v442_v59 }
 0x1b3   :  { %v377_v0 = vpop.f32.mrf.mxu2 }
 0x1b4   :  { %576 = vmatmul.bf16.gmra.mxu3 %v456_v63  ;;  %625 = vmatmul.bf16.gmra.mxu0 %v456_v63  ;;  %v408_v1 = vadd.f32 %v377_v0, %v223_v62 }
 0x1b6   :  { %v428_v4 = vadd.f32 %v1588_v29, %v408_v1 }
 0x1b8   :  { %v444_v8 = vmax.f32 %v428_v4, 0.0 }
 0x1bb   :  { %v379_v3 = vpop.f32.mrf.mxu2 }
 0x1bc   :  { %v409_v5 = vadd.f32 %v379_v3, %v225_v2 }
 0x1be   :  { %v429_v7 = vadd.f32 %v1588_v29, %v409_v5 }
 0x1c0   :  { %v445_v9 = vmax.f32 %v429_v7, 0.0 }
 0x1c2   :  { %v457_v10 = vpack.c.bf16 %v445_v9, %v444_v8 }
 0x1c3   :  { %v382_v11 = vpop.f32.mrf.mxu2 }
 0x1c4   :  { %581 = vmatmul.bf16.gmra.mxu3 %v457_v10  ;;  %630 = vmatmul.bf16.gmra.mxu0 %v457_v10  ;;  %v410_v12 = vadd.f32 %v382_v11, %v1449_v20 }
 0x1c6   :  { %v430_v15 = vadd.f32 %v1588_v29, %v410_v12 }
 0x1c8   :  { %v446_v28 = vmax.f32 %v430_v15, 0.0 }
 0x1cb   :  { %v384_v13 = vpop.f32.mrf.mxu2 }
 0x1cc   :  { %v411_v26 = vadd.f32 %v384_v13, %v1456_v22 }
 0x1ce   :  { %v431_v27 = vadd.f32 %v1588_v29, %v411_v26 }
 0x1d0   :  { %v447_v30 = vmax.f32 %v431_v27, 0.0 }
 0x1d2   :  { %v458_v31 = vpack.c.bf16 %v447_v30, %v446_v28  ;;  %v749_v30 = vlaneseq }
 0x1d3   :  { %v387_v32 = vpop.f32.mrf.mxu2 }
 0x1d4   :  { %586 = vmatmul.bf16.gmra.mxu3 %v458_v31  ;;  %635 = vmatmul.bf16.gmra.mxu0 %v458_v31  ;;  %v412_v33 = vadd.f32 %v387_v32, %v1459_v23  ;;  %v1622_v31 = vand.u32 127, %v749_v30 }
 0x1d6   :  { %v432_v36 = vadd.f32 %v1588_v29, %v412_v33  ;;  %vm751_vm0 = vcmp.lt.s32.totalorder %v1622_v31, 8 }
 0x1d8   :  { %v448_v38 = vmax.f32 %v432_v36, 0.0 }
 0x1db   :  { %v389_v34 = vpop.f32.mrf.mxu2 }
 0x1dc   :  { %v413_v20 = vadd.f32 %v389_v34, %v1491_v35 }
 0x1de   :  { %v433_v37 = vadd.f32 %v1588_v29, %v413_v20 }
 0x1e0   :  { %v449_v39 = vmax.f32 %v433_v37, 0.0 }
 0x1e2   :  { %v459_v22 = vpack.c.bf16 %v449_v39, %v448_v38 }
 0x1e3   :  { %v392_v40 = vpop.f32.mrf.mxu2 }
 0x1e4   :  { %591 = vmatmul.bf16.gmra.mxu3 %v459_v22  ;;  %640 = vmatmul.bf16.gmra.mxu0 %v459_v22  ;;  %v414_v41 = vadd.f32 %v392_v40, %v1522_v51 }
 0x1e6   :  { %v434_v43 = vadd.f32 %v1588_v29, %v414_v41 }
 0x1e8   :  { %v450_v45 = vmax.f32 %v434_v43, 0.0 }
 0x1eb   :  { %v394_v42 = vpop.f32.mrf.mxu2 }
 0x1ec   :  { %v415_v23 = vadd.f32 %v394_v42, %v1546_v61 }
 0x1ee   :  { %v435_v44 = vadd.f32 %v1588_v29, %v415_v23 }
 0x1f0   :  { %v451_v46 = vmax.f32 %v435_v44, 0.0 }
 0x1f2   :  { %v460_v35 = vpack.c.bf16 %v451_v46, %v450_v45 }
 0x1f3   :  { %v397_v47 = vpop.f32.mrf.mxu2 }
 0x1f4   :  { %596 = vmatmul.bf16.gmra.mxu3 %v460_v35  ;;  %645 = vmatmul.bf16.gmra.mxu0 %v460_v35  ;;  %v416_v48 = vadd.f32 %v397_v47, %v1581_v14 }
 0x1f6   :  { %v436_v52 = vadd.f32 %v1588_v29, %v416_v48 }
 0x1f8   :  { %v452_v54 = vmax.f32 %v436_v52, 0.0 }
 0x1fb   :  { %v399_v50 = vpop.f32.mrf.mxu2 }
 0x1fc   :  { %v417_v51 = vadd.f32 %v399_v50, %v1583_v25 }
 0x1fe   :  { %v437_v53 = vadd.f32 %v1588_v29, %v417_v51 }
 0x200   :  { %v453_v55 = vmax.f32 %v437_v53, 0.0 }
 0x202   :  { %v461_v61 = vpack.c.bf16 %v453_v55, %v452_v54 }
 0x204   :  { %601 = vmatmul.bf16.gmra.mxu3 %v461_v61  ;;  %650 = vmatmul.bf16.gmra.mxu0 %v461_v61 }
 0x211   :  { %v616_v56 = vpop.f32.mrf.mxu0 }
 0x217   :  { %v567_v26 = vpop.f32.mrf.mxu3 }
 0x219   :  { %v618_v57 = vpop.f32.mrf.mxu0 }
 0x21a   :  { %v656_v58 = vpack.c.bf16 %v618_v57, %v616_v56 }
 0x21f   :  { %v569_v27 = vpop.f32.mrf.mxu3 }
 0x221   :  { %v621_v59 = vpop.f32.mrf.mxu0 }
 0x227   :  { %v572_v28 = vpop.f32.mrf.mxu3 }
 0x229   :  { %v623_v60 = vpop.f32.mrf.mxu0 }
 0x22a   :  { %v657_v62 = vpack.c.bf16 %v623_v60, %v621_v59 }
 0x231   :  { %v626_v63 = vpop.f32.mrf.mxu0 }
 0x239   :  { %v628_v14 = vpop.f32.mrf.mxu0 }
 0x23a   :  { %v658_v0 = vpack.c.bf16 %v628_v14, %v626_v63 }
 0x241   :  { %v631_v1 = vpop.f32.mrf.mxu0 }
 0x249   :  { %v633_v2 = vpop.f32.mrf.mxu0 }
 0x24a   :  { %v659_v3 = vpack.c.bf16 %v633_v2, %v631_v1 }
 0x251   :  { %v636_v25 = vpop.f32.mrf.mxu0 }
 0x259   :  { %v638_v4 = vpop.f32.mrf.mxu0 }
 0x25a   :  { %v660_v15 = vpack.c.bf16 %v638_v4, %v636_v25 }
 0x261   :  { %v641_v29 = vpop.f32.mrf.mxu0 }
 0x269   :  { %v643_v5 = vpop.f32.mrf.mxu0 }
 0x26a   :  { %v661_v13 = vpack.c.bf16 %v643_v5, %v641_v29 }
 0x271   :  { %v646_v7 = vpop.f32.mrf.mxu0 }
 0x279   :  { %v648_v8 = vpop.f32.mrf.mxu0 }
 0x27a   :  { %v662_v12 = vpack.c.bf16 %v648_v8, %v646_v7 }
 0x281   :  { %v651_v9 = vpop.f32.mrf.mxu0 }
 0x289   :  { %v653_v10 = vpop.f32.mrf.mxu0 }
 0x28a   :  { %v663_v11 = vpack.c.bf16 %v653_v10, %v651_v9 }
 0x28c   :  { %664 = vmatpush.bf16.msrb.mxu1 %v663_v11 }
 0x290   :  { %665 = vmatpush.bf16.msrb.mxu1 %v662_v12 }
 0x294   :  { %666 = vmatpush.bf16.msrb.mxu1 %v661_v13 }
 0x298   :  { %667 = vmatpush.bf16.msrb.mxu1 %v660_v15 }
 0x29c   :  { %668 = vmatpush.bf16.msrb.mxu1 %v659_v3 }
 0x2a0   :  { %669 = vmatpush.bf16.msrb.mxu1 %v658_v0 }
 0x2a4   :  { %670 = vmatpush.bf16.msrb.mxu1 %v657_v62 }
 0x2a8   :  { %671 = vmatpush.bf16.msrb.mxu1 %v656_v58 }
 0x2ab   :  { %672 = vmatmul.bf16.vlgmr.msrb.gmra.mxu1 %v1428_v16  ;;  %v1627_v16 = vld [vmem:[%s1859_s5] ss:$0 sm:$0xff] }
 0x2bb   :  { %677 = vmatmul.bf16.gmra.mxu1 %v1434_v17  ;;  %v574_v17 = vpop.f32.mrf.mxu3 }
 0x2c3   :  { %v577_v32 = vpop.f32.mrf.mxu3 }
 0x2cb   :  { %682 = vmatmul.bf16.gmra.mxu1 %v1440_v18  ;;  %v579_v38 = vpop.f32.mrf.mxu3 }
 0x2d3   :  { %v582_v43 = vpop.f32.mrf.mxu3 }
 0x2db   :  { %687 = vmatmul.bf16.gmra.mxu1 %v1446_v19  ;;  %v584_v35 = vpop.f32.mrf.mxu3 }
 0x2e3   :  { %v587_v54 = vpop.f32.mrf.mxu3 }
 0x2eb   :  { %692 = vmatmul.bf16.gmra.mxu1 %v1454_v21  ;;  %v589_v59 = vpop.f32.mrf.mxu3 }
 0x2f3   :  { %v592_v1 = vpop.f32.mrf.mxu3 }
 0x2fb   :  { %697 = vmatmul.bf16.gmra.mxu1 %v1464_v24  ;;  %v594_v29 = vpop.f32.mrf.mxu3 }
 0x303   :  { %v597_v12 = vpop.f32.mrf.mxu3 }
 0x30b   :  { %702 = vmatmul.bf16.gmra.mxu1 %v1520_v49  ;;  %v599_v30 = vpop.f32.mrf.mxu3 }
 0x31b   :  { %707 = vmatmul.bf16.gmra.mxu1 %v1566_v6 }
 0x328   :  { %v673_v18 = vpop.f32.mrf.mxu1 }
 0x329   :  { %v713_v19 = vadd.f32 %v673_v18, %v567_v26 }
 0x32b   :  { %v733_v21 = vadd.f32 %v1627_v16, %v713_v19 }
 0x32d   :  { %v1633_v24 = vsel %vm751_vm0, %v733_v21, -inf }
 0x32e   :  { %768 = vmax.xlane.f32.xlu0 %v1633_v24 }
 0x330   :  { %v675_v49 = vpop.f32.mrf.mxu1 }
 0x331   :  { %v714_v6 = vadd.f32 %v675_v49, %v569_v27 }
 0x333   :  { %v734_v33 = vadd.f32 %v1627_v16, %v714_v6  ;;  %v602_v6 = vpop.f32.mrf.mxu3 }
 0x335   :  { %v1639_v34 = vsel %vm751_vm0, %v734_v33, -inf }
 0x336   :  { %770 = vmax.xlane.f32.xlu0 %v1639_v34 }
 0x338   :  { %v678_v36 = vpop.f32.mrf.mxu1 }
 0x339   :  { %v715_v20 = vadd.f32 %v678_v36, %v572_v28 }
 0x33b   :  { %v735_v37 = vadd.f32 %v1627_v16, %v715_v20 }
 0x33d   :  { %v1645_v39 = vsel %vm751_vm0, %v735_v37, -inf  ;;  %v604_v37 = vpop.f32.mrf.mxu3 }
 0x33e   :  { %772 = vmax.xlane.f32.xlu1 %v1645_v39 }
 0x340   :  { %v680_v22 = vpop.f32.mrf.mxu1 }
 0x341   :  { %v716_v40 = vadd.f32 %v680_v22, %v574_v17 }
 0x343   :  { %v736_v41 = vadd.f32 %v1627_v16, %v716_v40 }
 0x345   :  { %v1651_v42 = vsel %vm751_vm0, %v736_v41, -inf }
 0x346   :  { %774 = vmax.xlane.f32.xlu1 %v1651_v42 }
 0x348   :  { %v683_v23 = vpop.f32.mrf.mxu1 }
 0x349   :  { %v717_v44 = vadd.f32 %v683_v23, %v577_v32 }
 0x34b   :  { %v737_v45 = vadd.f32 %v1627_v16, %v717_v44 }
 0x34d   :  { %v1657_v46 = vsel %vm751_vm0, %v737_v45, -inf }
 0x34e   :  { %776 = vmax.xlane.f32.xlu2 %v1657_v46 }
 0x350   :  { %v685_v47 = vpop.f32.mrf.mxu1 }
 0x351   :  { %v718_v48 = vadd.f32 %v685_v47, %v579_v38 }
 0x353   :  { %v738_v50 = vadd.f32 %v1627_v16, %v718_v48 }
 0x355   :  { %v1663_v52 = vsel %vm751_vm0, %v738_v50, -inf }
 0x356   :  { %778 = vmax.xlane.f32.xlu2 %v1663_v52 }
 0x358   :  { %v688_v51 = vpop.f32.mrf.mxu1 }
 0x359   :  { %v719_v53 = vadd.f32 %v688_v51, %v582_v43 }
 0x35b   :  { %v739_v55 = vadd.f32 %v1627_v16, %v719_v53 }
 0x35d   :  { %v1669_v61 = vsel %vm751_vm0, %v739_v55, -inf }
 0x35e   :  { %780 = vmax.xlane.f32.xlu0 %v1669_v61 }
 0x360   :  { %v690_v56 = vpop.f32.mrf.mxu1 }
 0x361   :  { %v720_v57 = vadd.f32 %v690_v56, %v584_v35 }
 0x363   :  { %v740_v58 = vadd.f32 %v1627_v16, %v720_v57 }
 0x365   :  { %v1675_v60 = vsel %vm751_vm0, %v740_v58, -inf }
 0x366   :  { %782 = vmax.xlane.f32.xlu1 %v1675_v60 }
 0x368   :  { %v693_v62 = vpop.f32.mrf.mxu1 }
 0x369   :  { %v721_v63 = vadd.f32 %v693_v62, %v587_v54 }
 0x36b   :  { %v741_v14 = vadd.f32 %v1627_v16, %v721_v63 }
 0x36d   :  { %v1681_v0 = vsel %vm751_vm0, %v741_v14, -inf }
 0x36e   :  { %784 = vmax.xlane.f32.xlu2 %v1681_v0 }
 0x370   :  { %v695_v2 = vpop.f32.mrf.mxu1 }
 0x371   :  { %v722_v3 = vadd.f32 %v695_v2, %v589_v59 }
 0x373   :  { %v742_v25 = vadd.f32 %v1627_v16, %v722_v3 }
 0x375   :  { %v1687_v4 = vsel %vm751_vm0, %v742_v25, -inf }
 0x376   :  { %786 = vmax.xlane.f32.xlu0 %v1687_v4 }
 0x378   :  { %v698_v5 = vpop.f32.mrf.mxu1 }
 0x379   :  { %v723_v7 = vadd.f32 %v698_v5, %v592_v1 }
 0x37b   :  { %v743_v8 = vadd.f32 %v1627_v16, %v723_v7 }
 0x37d   :  { %v1693_v9 = vsel %vm751_vm0, %v743_v8, -inf }
 0x37e   :  { %788 = vmax.xlane.f32.xlu1 %v1693_v9 }
 0x380   :  { %v700_v10 = vpop.f32.mrf.mxu1 }
 0x381   :  { %v724_v11 = vadd.f32 %v700_v10, %v594_v29 }
 0x383   :  { %v744_v13 = vadd.f32 %v1627_v16, %v724_v11 }
 0x385   :  { %v1699_v15 = vsel %vm751_vm0, %v744_v13, -inf }
 0x386   :  { %790 = vmax.xlane.f32.xlu2 %v1699_v15 }
 0x388   :  { %v703_v26 = vpop.f32.mrf.mxu1 }
 0x389   :  { %v725_v27 = vadd.f32 %v703_v26, %v597_v12 }
 0x38b   :  { %v745_v28 = vadd.f32 %v1627_v16, %v725_v27 }
 0x38d   :  { %v1705_v17 = vsel %vm751_vm0, %v745_v28, -inf }
 0x38e   :  { %792 = vmax.xlane.f32.xlu0 %v1705_v17 }
 0x390   :  { %v705_v18 = vpop.f32.mrf.mxu1 }
 0x391   :  { %v726_v19 = vadd.f32 %v705_v18, %v599_v30 }
 0x393   :  { %v746_v21 = vadd.f32 %v1627_v16, %v726_v19 }
 0x395   :  { %v1711_v49 = vsel %vm751_vm0, %v746_v21, -inf }
 0x396   :  { %794 = vmax.xlane.f32.xlu1 %v1711_v49 }
 0x398   :  { %v708_v32 = vpop.f32.mrf.mxu1 }
 0x399   :  { %v727_v33 = vadd.f32 %v708_v32, %v602_v6 }
 0x39b   :  { %v747_v36 = vadd.f32 %v1627_v16, %v727_v33 }
 0x39d   :  { %v1717_v20 = vsel %vm751_vm0, %v747_v36, -inf }
 0x39e   :  { %796 = vmax.xlane.f32.xlu2 %v1717_v20 }
 0x3a0   :  { %v710_v38 = vpop.f32.mrf.mxu1 }
 0x3a1   :  { %v728_v22 = vadd.f32 %v710_v38, %v604_v37  ;;  %v769_v40 = vpop.xlane.xlu0 %768 }
 0x3a2   :  { %v1721_v41 = vsub.f32 %v1633_v24, %v769_v40 }
 0x3a3   :  { %v748_v43 = vadd.f32 %v1627_v16, %v728_v22 }
 0x3a4   :  { %v816_v23 = vmul.f32 1.442695, %v1721_v41 }
 0x3a5   :  { %v1727_v44 = vsel %vm751_vm0, %v748_v43, -inf }
 0x3a6   :  { %1206 = vpow2.f32 %v816_v23  ;;  %798 = vmax.xlane.f32.xlu0 %v1727_v44 }
 0x3a9   :  { %v771_v45 = vpop.xlane.xlu0 %770 }
 0x3aa   :  { %v1731_v35 = vsub.f32 %v1639_v34, %v771_v45 }
 0x3ac   :  { %v1207_v47 = vpop.eup %1206  ;;  %v818_v48 = vmul.f32 1.442695, %v1731_v35 }
 0x3ad   :  { %848 = vadd.xlane.f32.xlu1 %v1207_v47 }
 0x3ae   :  { %1208 = vpow2.f32 %v818_v48 }
 0x3b1   :  { %v773_v24 = vpop.xlane.xlu1 %772 }
 0x3b2   :  { %v1735_v16 = vsub.f32 %v1645_v39, %v773_v24 }
 0x3b4   :  { %v1209_v50 = vpop.eup %1208  ;;  %v820_v31 = vmul.f32 1.442695, %v1735_v16 }
 0x3b5   :  { %850 = vadd.xlane.f32.xlu2 %v1209_v50 }
 0x3b6   :  { %1210 = vpow2.f32 %v820_v31 }
 0x3b9   :  { %v775_v51 = vpop.xlane.xlu1 %774 }
 0x3ba   :  { %v1739_v53 = vsub.f32 %v1651_v42, %v775_v51 }
 0x3bc   :  { %v1211_v34 = vpop.eup %1210  ;;  %v822_v54 = vmul.f32 1.442695, %v1739_v53 }
 0x3bd   :  { %852 = vadd.xlane.f32.xlu0 %v1211_v34 }
 0x3be   :  { %1212 = vpow2.f32 %v822_v54 }
 0x3c1   :  { %v777_v55 = vpop.xlane.xlu2 %776 }
 0x3c2   :  { %v1743_v56 = vsub.f32 %v1657_v46, %v777_v55 }
 0x3c4   :  { %v1213_v39 = vpop.eup %1212  ;;  %v824_v57 = vmul.f32 1.442695, %v1743_v56 }
 0x3c5   :  { %854 = vadd.xlane.f32.xlu1 %v1213_v39 }
 0x3c6   :  { %1214 = vpow2.f32 %v824_v57 }
 0x3c9   :  { %v779_v58 = vpop.xlane.xlu2 %778 }
 0x3ca   :  { %v1747_v59 = vsub.f32 %v1663_v52, %v779_v58 }
 0x3cc   :  { %v1215_v42 = vpop.eup %1214  ;;  %v826_v62 = vmul.f32 1.442695, %v1747_v59 }
 0x3cd   :  { %856 = vadd.xlane.f32.xlu2 %v1215_v42 }
 0x3ce   :  { %1216 = vpow2.f32 %v826_v62 }
 0x3d1   :  { %v781_v63 = vpop.xlane.xlu0 %780 }
 0x3d2   :  { %v1751_v14 = vsub.f32 %v1669_v61, %v781_v63 }
 0x3d4   :  { %v1217_v46 = vpop.eup %1216  ;;  %v828_v1 = vmul.f32 1.442695, %v1751_v14 }
 0x3d5   :  { %858 = vadd.xlane.f32.xlu0 %v1217_v46 }
 0x3d6   :  { %1218 = vpow2.f32 %v828_v1 }
 0x3d9   :  { %v783_v2 = vpop.xlane.xlu1 %782 }
 0x3da   :  { %v1755_v3 = vsub.f32 %v1675_v60, %v783_v2 }
 0x3dc   :  { %v1219_v52 = vpop.eup %1218  ;;  %v830_v25 = vmul.f32 1.442695, %v1755_v3 }
 0x3dd   :  { %860 = vadd.xlane.f32.xlu1 %v1219_v52 }
 0x3de   :  { %1220 = vpow2.f32 %v830_v25 }
 0x3e1   :  { %v785_v29 = vpop.xlane.xlu2 %784 }
 0x3e2   :  { %v1759_v5 = vsub.f32 %v1681_v0, %v785_v29 }
 0x3e4   :  { %v1221_v61 = vpop.eup %1220  ;;  %v832_v7 = vmul.f32 1.442695, %v1759_v5 }
 0x3e5   :  { %862 = vadd.xlane.f32.xlu2 %v1221_v61 }
 0x3e6   :  { %1222 = vpow2.f32 %v832_v7 }
 0x3e9   :  { %v787_v8 = vpop.xlane.xlu0 %786 }
 0x3ea   :  { %v1763_v10 = vsub.f32 %v1687_v4, %v787_v8 }
 0x3ec   :  { %v1223_v60 = vpop.eup %1222  ;;  %v834_v11 = vmul.f32 1.442695, %v1763_v10 }
 0x3ed   :  { %864 = vadd.xlane.f32.xlu0 %v1223_v60 }
 0x3ee   :  { %1224 = vpow2.f32 %v834_v11 }
 0x3f1   :  { %v789_v12 = vpop.xlane.xlu1 %788 }
 0x3f2   :  { %v1767_v13 = vsub.f32 %v1693_v9, %v789_v12 }
 0x3f4   :  { %v1225_v0 = vpop.eup %1224  ;;  %v836_v26 = vmul.f32 1.442695, %v1767_v13 }
 0x3f5   :  { %866 = vadd.xlane.f32.xlu1 %v1225_v0 }
 0x3f6   :  { %1226 = vpow2.f32 %v836_v26 }
 0x3f9   :  { %v791_v27 = vpop.xlane.xlu2 %790 }
 0x3fa   :  { %v1771_v28 = vsub.f32 %v1699_v15, %v791_v27 }
 0x3fc   :  { %v1227_v4 = vpop.eup %1226  ;;  %v838_v30 = vmul.f32 1.442695, %v1771_v28 }
 0x3fd   :  { %868 = vadd.xlane.f32.xlu2 %v1227_v4 }
 0x3fe   :  { %1228 = vpow2.f32 %v838_v30 }
 0x401   :  { %v793_v18 = vpop.xlane.xlu0 %792 }
 0x402   :  { %v1775_v19 = vsub.f32 %v1705_v17, %v793_v18 }
 0x404   :  { %v1229_v9 = vpop.eup %1228  ;;  %v840_v21 = vmul.f32 1.442695, %v1775_v19 }
 0x405   :  { %870 = vadd.xlane.f32.xlu0 %v1229_v9 }
 0x406   :  { %1230 = vpow2.f32 %v840_v21 }
 0x409   :  { %v795_v6 = vpop.xlane.xlu1 %794 }
 0x40a   :  { %v1779_v32 = vsub.f32 %v1711_v49, %v795_v6 }
 0x40c   :  { %v1231_v15 = vpop.eup %1230  ;;  %v842_v33 = vmul.f32 1.442695, %v1779_v32 }
 0x40d   :  { %872 = vadd.xlane.f32.xlu1 %v1231_v15 }
 0x40e   :  { %1232 = vpow2.f32 %v842_v33 }
 0x411   :  { %v797_v36 = vpop.xlane.xlu2 %796 }
 0x412   :  { %v1783_v37 = vsub.f32 %v1717_v20, %v797_v36 }
 0x414   :  { %v1233_v17 = vpop.eup %1232  ;;  %v844_v38 = vmul.f32 1.442695, %v1783_v37 }
 0x415   :  { %874 = vadd.xlane.f32.xlu2 %v1233_v17 }
 0x416   :  { %1234 = vpow2.f32 %v844_v38 }
 0x419   :  { %v799_v22 = vpop.xlane.xlu0 %798 }
 0x41a   :  { %v1787_v40 = vsub.f32 %v1727_v44, %v799_v22 }
 0x41c   :  { %v1235_v49 = vpop.eup %1234  ;;  %v846_v43 = vmul.f32 1.442695, %v1787_v40 }
 0x41d   :  { %876 = vadd.xlane.f32.xlu0 %v1235_v49 }
 0x41e   :  { %1236 = vpow2.f32 %v846_v43 }
 0x420   :  { %v849_v23 = vpop.xlane.xlu1 %848 }
 0x421   :  { %1238 = vlog2.f32 %v849_v23 }
 0x424   :  { %v1237_v45 = vpop.eup %1236 }
 0x425   :  { %878 = vadd.xlane.f32.xlu1 %v1237_v45 }
 0x427   :  { %v1239_v20 = vpop.eup %1238 }
 0x428   :  { %v881_v47 = vmul.f32 0.6931472, %v1239_v20  ;;  %v851_v48 = vpop.xlane.xlu2 %850 }
 0x429   :  { %1240 = vlog2.f32 %v851_v48 }
 0x42a   :  { %v912_v24 = vsub.f32 %v1721_v41, %v881_v47 }
 0x42c   :  { %928 = vst [vmem:[%s1860_s6] sm:$0xff] %v912_v24 }
 0x42f   :  { %v1241_v44 = vpop.eup %1240 }
 0x430   :  { %v883_v50 = vmul.f32 0.6931472, %v1241_v44  ;;  %v853_v31 = vpop.xlane.xlu0 %852 }
 0x431   :  { %1242 = vlog2.f32 %v853_v31 }
 0x432   :  { %v913_v51 = vsub.f32 %v1731_v35, %v883_v50 }
 0x434   :  { %929 = vst [vmem:[%s1860_s6 + $0x8] sm:$0xff] %v913_v51 }
 0x437   :  { %v1243_v34 = vpop.eup %1242 }
 0x438   :  { %v885_v54 = vmul.f32 0.6931472, %v1243_v34  ;;  %v855_v55 = vpop.xlane.xlu1 %854 }
 0x439   :  { %1244 = vlog2.f32 %v855_v55 }
 0x43a   :  { %v914_v41 = vsub.f32 %v1735_v16, %v885_v54 }
 0x43c   :  { %930 = vst [vmem:[%s1860_s6 + $0x10] sm:$0xff] %v914_v41 }
 0x43f   :  { %v1245_v39 = vpop.eup %1244 }
 0x440   :  { %v887_v57 = vmul.f32 0.6931472, %v1245_v39  ;;  %v857_v58 = vpop.xlane.xlu2 %856 }
 0x441   :  { %1246 = vlog2.f32 %v857_v58 }
 0x442   :  { %v915_v35 = vsub.f32 %v1739_v53, %v887_v57 }
 0x444   :  { %931 = vst [vmem:[%s1860_s6 + $0x18] sm:$0xff] %v915_v35 }
 0x447   :  { %v1247_v42 = vpop.eup %1246 }
 0x448   :  { %v889_v62 = vmul.f32 0.6931472, %v1247_v42  ;;  %v859_v63 = vpop.xlane.xlu0 %858 }
 0x449   :  { %1248 = vlog2.f32 %v859_v63 }
 0x44a   :  { %v916_v16 = vsub.f32 %v1743_v56, %v889_v62 }
 0x44c   :  { %932 = vst [vmem:[%s1860_s6 + $0x20] sm:$0xff] %v916_v16 }
 0x44f   :  { %v1249_v46 = vpop.eup %1248 }
 0x450   :  { %v891_v1 = vmul.f32 0.6931472, %v1249_v46  ;;  %v861_v2 = vpop.xlane.xlu1 %860 }
 0x451   :  { %1250 = vlog2.f32 %v861_v2 }
 0x452   :  { %v917_v53 = vsub.f32 %v1747_v59, %v891_v1 }
 0x454   :  { %933 = vst [vmem:[%s1860_s6 + $0x28] sm:$0xff] %v917_v53 }
 0x457   :  { %v1251_v52 = vpop.eup %1250 }
 0x458   :  { %v893_v25 = vmul.f32 0.6931472, %v1251_v52  ;;  %v863_v29 = vpop.xlane.xlu2 %862 }
 0x459   :  { %1252 = vlog2.f32 %v863_v29 }
 0x45a   :  { %v918_v56 = vsub.f32 %v1751_v14, %v893_v25 }
 0x45c   :  { %934 = vst [vmem:[%s1860_s6 + $0x30] sm:$0xff] %v918_v56 }
 0x45f   :  { %v1253_v61 = vpop.eup %1252 }
 0x460   :  { %v895_v7 = vmul.f32 0.6931472, %v1253_v61  ;;  %v865_v8 = vpop.xlane.xlu0 %864 }
 0x461   :  { %1254 = vlog2.f32 %v865_v8 }
 0x462   :  { %v919_v59 = vsub.f32 %v1755_v3, %v895_v7 }
 0x464   :  { %935 = vst [vmem:[%s1860_s6 + $0x38] sm:$0xff] %v919_v59 }
 0x467   :  { %v1255_v60 = vpop.eup %1254 }
 0x468   :  { %v897_v11 = vmul.f32 0.6931472, %v1255_v60  ;;  %v867_v12 = vpop.xlane.xlu1 %866 }
 0x469   :  { %1256 = vlog2.f32 %v867_v12 }
 0x46a   :  { %v920_v14 = vsub.f32 %v1759_v5, %v897_v11 }
 0x46c   :  { %936 = vst [vmem:[%s1860_s6 + $0x40] sm:$0xff] %v920_v14 }
 0x46f   :  { %v1257_v0 = vpop.eup %1256 }
 0x470   :  { %v899_v26 = vmul.f32 0.6931472, %v1257_v0  ;;  %v869_v27 = vpop.xlane.xlu2 %868 }
 0x471   :  { %1258 = vlog2.f32 %v869_v27 }
 0x472   :  { %v921_v3 = vsub.f32 %v1763_v10, %v899_v26 }
 0x474   :  { %937 = vst [vmem:[%s1860_s6 + $0x48] sm:$0xff] %v921_v3 }
 0x477   :  { %v1259_v4 = vpop.eup %1258 }
 0x478   :  { %v901_v30 = vmul.f32 0.6931472, %v1259_v4  ;;  %v871_v18 = vpop.xlane.xlu0 %870 }
 0x479   :  { %1260 = vlog2.f32 %v871_v18 }
 0x47a   :  { %v922_v5 = vsub.f32 %v1767_v13, %v901_v30 }
 0x47c   :  { %938 = vst [vmem:[%s1860_s6 + $0x50] sm:$0xff] %v922_v5 }
 0x47f   :  { %v1261_v9 = vpop.eup %1260 }
 0x480   :  { %v903_v21 = vmul.f32 0.6931472, %v1261_v9  ;;  %v873_v6 = vpop.xlane.xlu1 %872 }
 0x481   :  { %1262 = vlog2.f32 %v873_v6 }
 0x482   :  { %v923_v10 = vsub.f32 %v1771_v28, %v903_v21 }
 0x484   :  { %939 = vst [vmem:[%s1860_s6 + $0x58] sm:$0xff] %v923_v10 }
 0x487   :  { %v1263_v15 = vpop.eup %1262 }
 0x488   :  { %v905_v33 = vmul.f32 0.6931472, %v1263_v15  ;;  %v875_v36 = vpop.xlane.xlu2 %874 }
 0x489   :  { %1264 = vlog2.f32 %v875_v36 }
 0x48a   :  { %v924_v13 = vsub.f32 %v1775_v19, %v905_v33 }
 0x48c   :  { %940 = vst [vmem:[%s1860_s6 + $0x60] sm:$0xff] %v924_v13 }
 0x48f   :  { %v1265_v17 = vpop.eup %1264 }
 0x490   :  { %v907_v38 = vmul.f32 0.6931472, %v1265_v17  ;;  %v877_v22 = vpop.xlane.xlu0 %876 }
 0x491   :  { %1266 = vlog2.f32 %v877_v22 }
 0x492   :  { %v925_v28 = vsub.f32 %v1779_v32, %v907_v38 }
 0x494   :  { %941 = vst [vmem:[%s1860_s6 + $0x68] sm:$0xff] %v925_v28 }
 0x497   :  { %v1267_v49 = vpop.eup %1266 }
 0x498   :  { %v909_v43 = vmul.f32 0.6931472, %v1267_v49  ;;  %v879_v23 = vpop.xlane.xlu1 %878 }
 0x499   :  { %1268 = vlog2.f32 %v879_v23 }
 0x49a   :  { %v926_v19 = vsub.f32 %v1783_v37, %v909_v43 }
 0x49c   :  { %942 = vst [vmem:[%s1860_s6 + $0x70] sm:$0xff] %v926_v19 }
 0x49f   :  { %v1269_v45 = vpop.eup %1268 }
 0x4a0   :  { %v911_v20 = vmul.f32 0.6931472, %v1269_v45 }
 0x4a2   :  { %v927_v47 = vsub.f32 %v1787_v40, %v911_v20 }
 0x4a4   :  { %943 = vst [vmem:[%s1860_s6 + $0x78] sm:$0xff] %v927_v47 }

</bundles_post_ra>
